<compile_context>
chip_gen: v5e
topology: v5e:2x2
jax: 0.10.0
libtpu: 0.0.40
codegen_flags: <defaults>
</compile_context>

<pallas_src>
import functools

import jax
import jax.numpy as jnp
from jax.experimental import pallas as pl
from jax.experimental.pallas import tpu as pltpu


_NEG_INF = -1e30  # bias for padded class lanes -> exp() == 0 in the softmax


def _round_up(a: int, b: int) -> int:
    return (a + b - 1) // b * b


def _choose_tiles(n: int, d_in: int, latent_dim: int, itemsize: int):
    """Pick (tm, tk) so the double-buffered x / w_enc tiles stay well inside
    scoped VMEM on every generation (v5e 16 MiB default, v6e 32 MiB,
    v7x 32 MiB default / 64 MiB physical)."""
    tm = min(128, _round_up(max(n, 1), 8))      # batch tile, 8-sublane multiple
    budget = 8 * 1024 * 1024                    # headroom for heads/outputs/acc
    tk = min(512, _round_up(d_in, 128))         # K tile (multiple of 128)
    while tk > 128 and 2 * (tm * tk + tk * latent_dim) * itemsize > budget:
        tk -= 128
    return tm, tk


def classifier_kernel(
    x_ref,          # (tm, tk)       flattened-image tile (K slice)
    w_enc_ref,      # (tk, L)        encoder weight K slice (streams over k)
    b_enc_ref,      # (1, L)         encoder bias (f32)
    w_heads_ref,    # (L, 2*CP)      block-diagonal fused head weights
    b_heads_ref,    # (1, 2*CP)      fused head biases (pad lanes = -1e30)
    preds_lab_ref,  # (tm, CP) out   lane-dense softmax probs, labeled head
    preds_un_ref,   # (tm, CP) out   lane-dense softmax probs, unlabeled head
    acc_ref,        # (tm, L)  f32 VMEM scratch: latent_mu accumulator
    *,
    cp: int,
):
    k = pl.program_id(1)

    # ---- init: seed the accumulator with the encoder bias -----------------
    @pl.when(k == 0)
    def _():
        acc_ref[...] = jnp.broadcast_to(
            b_enc_ref[...].astype(jnp.float32), acc_ref.shape)

    # ---- streamed encoder matmul: mu += x_k @ W_enc_k (f32 accumulate) ----
    acc_ref[...] += jnp.dot(
        x_ref[...], w_enc_ref[...], preferred_element_type=jnp.float32)

    # ---- finalize: fused heads + per-head softmax --------------------------
    @pl.when(k == pl.num_programs(1) - 1)
    def _():
        mu = acc_ref[...]
        logits = jnp.dot(
            mu.astype(w_heads_ref.dtype), w_heads_ref[...],
            preferred_element_type=jnp.float32) + b_heads_ref[...]

        def _softmax(z):  # f32 math on every generation (v5e has no bf16 VPU)
            z = z - jnp.max(z, axis=-1, keepdims=True)
            e = jnp.exp(z)
            # exact reciprocal keeps the tight f32 self-check; approx=True is
            # a free EUP-slot micro-opt if ~1e-3 relative error is acceptable.
            return e * pl.reciprocal(jnp.sum(e, axis=-1, keepdims=True),
                                     approx=False)

        # split at CP (multiple of 128): lane-aligned, no XLU shuffles, and
        # both stores are full 128-lane (no masked vst.msk writeback).
        preds_lab_ref[...] = _softmax(logits[:, :cp]).astype(preds_lab_ref.dtype)
        preds_un_ref[...] = _softmax(logits[:, cp:]).astype(preds_un_ref.dtype)


def classifier_forward(x, params, *, latent_dim_class,
                       matmul_dtype=jnp.float32):
    """x: (N, C, H, W). Returns {'preds_labeled', 'preds_unlabeled'}."""
    w_enc = params["w_enc"]
    b_enc = params["b_enc"].astype(jnp.float32)
    w_lab, b_lab = params["w_lab"], params["b_lab"]
    w_un, b_un = params["w_un"], params["b_un"]

    latent_dim = w_enc.shape[1]
    n_classes = w_lab.shape[1]
    cp = _round_up(max(n_classes, 1), 128)      # lane-dense class width

    # ---- fuse heads into one block-diagonal (L, 2*CP) matmul --------------
    # logits_lab = mu @ W[:, :CP] + b  (rows >= Lc are zero), likewise for the
    # unlabeled head in columns [CP, 2*CP): the kernel never slices mu at the
    # unaligned column latent_dim_class.  Padded class lanes get -1e30 bias so
    # they contribute exactly 0 to the softmax.
    w_heads = jnp.zeros((latent_dim, 2 * cp), jnp.float32)
    w_heads = w_heads.at[:latent_dim_class, :n_classes].set(w_lab)
    w_heads = w_heads.at[latent_dim_class:, cp:cp + n_classes].set(w_un)
    b_heads = jnp.full((1, 2 * cp), _NEG_INF, jnp.float32)
    b_heads = b_heads.at[:, :n_classes].set(b_lab.reshape(1, -1))
    b_heads = b_heads.at[:, cp:cp + n_classes].set(b_un.reshape(1, -1))

    # ---- flatten (torch.flatten(x, 1)) + pad to tile multiples ------------
    n = x.shape[0]
    x_flat = x.reshape(n, -1)
    d_in = x_flat.shape[1]
    itemsize = jnp.dtype(matmul_dtype).itemsize
    tm, tk = _choose_tiles(n, d_in, latent_dim, itemsize)
    n_pad = _round_up(n, tm)
    d_pad = _round_up(d_in, tk)

    x_p = jnp.zeros((n_pad, d_pad), matmul_dtype)
    x_p = x_p.at[:n, :d_in].set(x_flat.astype(matmul_dtype))
    w_enc_p = jnp.zeros((d_pad, latent_dim), matmul_dtype)
    w_enc_p = w_enc_p.at[:d_in, :].set(w_enc.astype(matmul_dtype))
    w_heads = w_heads.astype(matmul_dtype)

    grid = (n_pad // tm, d_pad // tk)
    kernel = functools.partial(classifier_kernel, cp=cp)

    flops = 2 * n_pad * d_pad * latent_dim + 2 * n_pad * latent_dim * 2 * cp
    bytes_accessed = (
        n_pad * d_pad * itemsize                     # x, read once
        + grid[0] * d_pad * latent_dim * itemsize    # w_enc, once per m tile
        + grid[0] * (latent_dim + 1) * 2 * cp * 4    # fused heads per m tile
        + latent_dim * 4                             # b_enc
        + 2 * n_pad * cp * 4)                        # outputs

    preds_lab, preds_un = pl.pallas_call(
        kernel,
        out_shape=(
            jax.ShapeDtypeStruct((n_pad, cp), jnp.float32),
            jax.ShapeDtypeStruct((n_pad, cp), jnp.float32),
        ),
        grid_spec=pltpu.PrefetchScalarGridSpec(
            num_scalar_prefetch=0,
            grid=grid,
            in_specs=[
                pl.BlockSpec((tm, tk), lambda i, k: (i, k)),              # x
                pl.BlockSpec((tk, latent_dim), lambda i, k: (k, 0)),      # w_enc
                pl.BlockSpec((1, latent_dim), lambda i, k: (0, 0)),       # b_enc
                pl.BlockSpec((latent_dim, 2 * cp), lambda i, k: (0, 0)),  # heads
                pl.BlockSpec((1, 2 * cp), lambda i, k: (0, 0)),           # head b
            ],
            out_specs=(
                pl.BlockSpec((tm, cp), lambda i, k: (i, 0)),
                pl.BlockSpec((tm, cp), lambda i, k: (i, 0)),
            ),
            scratch_shapes=[pltpu.VMEM((tm, latent_dim), jnp.float32)],
        ),
        compiler_params=pltpu.CompilerParams(
            dimension_semantics=("parallel", "arbitrary"),
            vmem_limit_bytes=32 * 1024 * 1024,
        ),
        cost_estimate=pl.CostEstimate(
            flops=flops,
            transcendentals=n_pad * 2 * cp,
            bytes_accessed=bytes_accessed),
    )(x_p, w_enc_p, b_enc, w_heads, b_heads)

    return {
        "preds_labeled": preds_lab[:n, :n_classes],
        "preds_unlabeled": preds_un[:n, :n_classes],
    }


def init_params(key, d_in, latent_dim, latent_dim_class, n_classes):
    k1, k2, k3, k4, k5, k6 = jax.random.split(key, 6)
    lc = latent_dim_class
    lu = latent_dim - latent_dim_class
    return {
        # encoder (frozen in the torch module; fixed weights here)
        "w_enc": jax.random.normal(k1, (d_in, latent_dim), jnp.float32) * 0.02,
        "b_enc": jax.random.normal(k2, (1, latent_dim), jnp.float32) * 0.02,
        # last_layer_labeled: Linear(latent_dim_class, n_classes)
        "w_lab": jax.random.normal(k3, (lc, n_classes), jnp.float32) * 0.1,
        "b_lab": jax.random.normal(k4, (1, n_classes), jnp.float32) * 0.1,
        # last_layer_unlabeled: Linear(latent_dim - latent_dim_class, n_classes)
        "w_un": jax.random.normal(k5, (lu, n_classes), jnp.float32) * 0.1,
        "b_un": jax.random.normal(k6, (1, n_classes), jnp.float32) * 0.1,
    }


if __name__ == "__main__":
    # Small shapes consistent with the module's forward.
    N, C, H, W = 2, 4, 16, 16
    latent_dim = 32
    latent_dim_class = 16
    n_classes = 8
    d_in = C * H * W

    key = jax.random.PRNGKey(0)
    kx, kp = jax.random.split(key)
    x = jax.random.normal(kx, (N, C, H, W), jnp.float32)
    params = init_params(kp, d_in, latent_dim, latent_dim_class, n_classes)

    # Reference in plain JAX (f32).
    x_flat = x.reshape(N, -1)
    mu = x_flat @ params["w_enc"] + params["b_enc"]
    ref_lab = jax.nn.softmax(
        mu[:, :latent_dim_class] @ params["w_lab"] + params["b_lab"], axis=-1)
    ref_un = jax.nn.softmax(
        mu[:, latent_dim_class:] @ params["w_un"] + params["b_un"], axis=-1)

    # f32 matmul path (tight tolerance).
    out = classifier_forward(x, params, latent_dim_class=latent_dim_class)
    jax.block_until_ready(out)
    assert out["preds_labeled"].shape == (N, n_classes)
    assert out["preds_unlabeled"].shape == (N, n_classes)
    assert jnp.allclose(out["preds_labeled"], ref_lab, atol=1e-5)
    assert jnp.allclose(out["preds_unlabeled"], ref_un, atol=1e-5)

    # bf16 matmul path (f32 accumulation / f32 softmax), looser tolerance.
    out_bf16 = classifier_forward(
        x, params, latent_dim_class=latent_dim_class,
        matmul_dtype=jnp.bfloat16)
    jax.block_until_ready(out_bf16)
    assert jnp.allclose(out_bf16["preds_labeled"], ref_lab, atol=2e-2)
    assert jnp.allclose(out_bf16["preds_unlabeled"], ref_un, atol=2e-2)

    print("KERNEL_OK")
</pallas_src>

<mosaic_0001>
module attributes {stable_mosaic.version = 11 : i64} {
  func.func @classifier_kernel(%arg0: i32, %arg1: i32, %arg2: memref<8x512xf32, #tpu.memory_space<vmem>>, %arg3: memref<512x32xf32, #tpu.memory_space<vmem>>, %arg4: memref<1x32xf32, #tpu.memory_space<vmem>>, %arg5: memref<32x256xf32, #tpu.memory_space<vmem>>, %arg6: memref<1x256xf32, #tpu.memory_space<vmem>>, %arg7: memref<8x128xf32, #tpu.memory_space<vmem>>, %arg8: memref<8x128xf32, #tpu.memory_space<vmem>>, %arg9: memref<8x32xf32, #tpu.memory_space<vmem>>) attributes {dimension_semantics = [#tpu.dimension_semantics<parallel>, #tpu.dimension_semantics<arbitrary>], iteration_bounds = array<i64: 1, 2>, scalar_prefetch = 0 : i64, scratch_operands = 1 : i64, tpu.core_type = #tpu.core_type<tc>, window_params = [{transform_indices = @transform_0, window_bounds = array<i64: 8, 512>}, {transform_indices = @transform_1, window_bounds = array<i64: 512, 32>}, {pipeline_mode = #tpu.pipeline_mode<synchronous>, transform_indices = @transform_2, window_bounds = array<i64: 1, 32>}, {pipeline_mode = #tpu.pipeline_mode<synchronous>, transform_indices = @transform_3, window_bounds = array<i64: 32, 256>}, {pipeline_mode = #tpu.pipeline_mode<synchronous>, transform_indices = @transform_4, window_bounds = array<i64: 1, 256>}, {transform_indices = @transform_5, window_bounds = array<i64: 8, 128>}, {transform_indices = @transform_6, window_bounds = array<i64: 8, 128>}]} {
    %c0_i32 = arith.constant 0 : i32
    %0 = arith.cmpi eq, %arg1, %c0_i32 : i32
    %1 = arith.extui %0 : i1 to i32
    %c0_i32_0 = arith.constant 0 : i32
    %2 = arith.cmpi ne, %1, %c0_i32_0 : i32
    scf.if %2 {
      %c0_9 = arith.constant 0 : index
      %c0_10 = arith.constant 0 : index
      %12 = vector.load %arg4[%c0_9, %c0_10] : memref<1x32xf32, #tpu.memory_space<vmem>>, vector<1x32xf32>
      %13 = vector.shape_cast %12 : vector<1x32xf32> to vector<1x32xf32>
      %14 = vector.broadcast %13 : vector<1x32xf32> to vector<8x32xf32>
      %c0_11 = arith.constant 0 : index
      %c0_12 = arith.constant 0 : index
      %15 = vector.load %arg9[%c0_11, %c0_12] : memref<8x32xf32, #tpu.memory_space<vmem>>, vector<8x32xf32>
      tpu.vector_store %arg9[%c0_11, %c0_12], %14 {strides = array<i32>} : memref<8x32xf32, #tpu.memory_space<vmem>>, vector<8x32xf32>,
    } else {
    }
    %c0 = arith.constant 0 : index
    %c0_1 = arith.constant 0 : index
    %3 = vector.load %arg9[%c0, %c0_1] : memref<8x32xf32, #tpu.memory_space<vmem>>, vector<8x32xf32>
    %c0_2 = arith.constant 0 : index
    %c0_3 = arith.constant 0 : index
    %4 = vector.load %arg2[%c0_2, %c0_3] : memref<8x512xf32, #tpu.memory_space<vmem>>, vector<8x512xf32>
    %c0_4 = arith.constant 0 : index
    %c0_5 = arith.constant 0 : index
    %5 = vector.load %arg3[%c0_4, %c0_5] : memref<512x32xf32, #tpu.memory_space<vmem>>, vector<512x32xf32>
    %cst = arith.constant dense<0.000000e+00> : vector<8x32xf32>
    %6 = tpu.matmul %4, %5, %cst {dimension_numbers = #tpu.dot_dimension_numbers<[1], [0], [0], [1], [0, 0, 1, 1], [], []>} : vector<8x512xf32>, vector<512x32xf32>, vector<8x32xf32> -> vector<8x32xf32>
    %7 = arith.addf %3, %6 : vector<8x32xf32>
    %c0_6 = arith.constant 0 : index
    %c0_7 = arith.constant 0 : index
    %8 = vector.load %arg9[%c0_6, %c0_7] : memref<8x32xf32, #tpu.memory_space<vmem>>, vector<8x32xf32>
    tpu.vector_store %arg9[%c0_6, %c0_7], %7 {strides = array<i32>} : memref<8x32xf32, #tpu.memory_space<vmem>>, vector<8x32xf32>,
    %c1_i32 = arith.constant 1 : i32
    %9 = arith.cmpi eq, %arg1, %c1_i32 : i32
    %10 = arith.extui %9 : i1 to i32
    %c0_i32_8 = arith.constant 0 : i32
    %11 = arith.cmpi ne, %10, %c0_i32_8 : i32
    scf.if %11 {
      %c0_9 = arith.constant 0 : index
      %c0_10 = arith.constant 0 : index
      %12 = vector.load %arg9[%c0_9, %c0_10] : memref<8x32xf32, #tpu.memory_space<vmem>>, vector<8x32xf32>
      %c0_11 = arith.constant 0 : index
      %c0_12 = arith.constant 0 : index
      %13 = vector.load %arg5[%c0_11, %c0_12] : memref<32x256xf32, #tpu.memory_space<vmem>>, vector<32x256xf32>
      %cst_13 = arith.constant dense<0.000000e+00> : vector<8x256xf32>
      %14 = tpu.matmul %12, %13, %cst_13 {dimension_numbers = #tpu.dot_dimension_numbers<[1], [0], [0], [1], [0, 0, 1, 1], [], []>} : vector<8x32xf32>, vector<32x256xf32>, vector<8x256xf32> -> vector<8x256xf32>
      %c0_14 = arith.constant 0 : index
      %c0_15 = arith.constant 0 : index
      %15 = vector.load %arg6[%c0_14, %c0_15] : memref<1x256xf32, #tpu.memory_space<vmem>>, vector<1x256xf32>
      %16 = vector.broadcast %15 : vector<1x256xf32> to vector<8x256xf32>
      %17 = arith.addf %14, %16 : vector<8x256xf32>
      %18 = vector.extract_strided_slice %17 {offsets = [0, 0], sizes = [8, 128], strides = [1, 1]} : vector<8x256xf32> to vector<8x128xf32>
      %cst_16 = arith.constant dense<0xFF800000> : vector<8xf32>
      %19 = vector.multi_reduction <maximumf>, %18, %cst_16 [1] : vector<8x128xf32> to vector<8xf32>
      %20 = vector.shape_cast %19 : vector<8xf32> to vector<8x1xf32>
      %21 = vector.broadcast %20 : vector<8x1xf32> to vector<8x128xf32>
      %22 = arith.subf %18, %21 : vector<8x128xf32>
      %23 = math.exp %22 : vector<8x128xf32>
      %cst_17 = arith.constant dense<0.000000e+00> : vector<8xf32>
      %24 = vector.multi_reduction <add>, %23, %cst_17 [1] : vector<8x128xf32> to vector<8xf32>
      %25 = vector.shape_cast %24 : vector<8xf32> to vector<8x1xf32>
      %26 = tpu.reciprocal %25 : vector<8x1xf32> -> vector<8x1xf32>
      %27 = vector.broadcast %26 : vector<8x1xf32> to vector<8x128xf32>
      %28 = arith.mulf %23, %27 : vector<8x128xf32>
      %c0_18 = arith.constant 0 : index
      %c0_19 = arith.constant 0 : index
      %29 = vector.load %arg7[%c0_18, %c0_19] : memref<8x128xf32, #tpu.memory_space<vmem>>, vector<8x128xf32>
      tpu.vector_store %arg7[%c0_18, %c0_19], %28 {strides = array<i32>} : memref<8x128xf32, #tpu.memory_space<vmem>>, vector<8x128xf32>,
      %30 = vector.extract_strided_slice %17 {offsets = [0, 128], sizes = [8, 128], strides = [1, 1]} : vector<8x256xf32> to vector<8x128xf32>
      %cst_20 = arith.constant dense<0xFF800000> : vector<8xf32>
      %31 = vector.multi_reduction <maximumf>, %30, %cst_20 [1] : vector<8x128xf32> to vector<8xf32>
      %32 = vector.shape_cast %31 : vector<8xf32> to vector<8x1xf32>
      %33 = vector.broadcast %32 : vector<8x1xf32> to vector<8x128xf32>
      %34 = arith.subf %30, %33 : vector<8x128xf32>
      %35 = math.exp %34 : vector<8x128xf32>
      %cst_21 = arith.constant dense<0.000000e+00> : vector<8xf32>
      %36 = vector.multi_reduction <add>, %35, %cst_21 [1] : vector<8x128xf32> to vector<8xf32>
      %37 = vector.shape_cast %36 : vector<8xf32> to vector<8x1xf32>
      %38 = tpu.reciprocal %37 : vector<8x1xf32> -> vector<8x1xf32>
      %39 = vector.broadcast %38 : vector<8x1xf32> to vector<8x128xf32>
      %40 = arith.mulf %35, %39 : vector<8x128xf32>
      %c0_22 = arith.constant 0 : index
      %c0_23 = arith.constant 0 : index
      %41 = vector.load %arg8[%c0_22, %c0_23] : memref<8x128xf32, #tpu.memory_space<vmem>>, vector<8x128xf32>
      tpu.vector_store %arg8[%c0_22, %c0_23], %40 {strides = array<i32>} : memref<8x128xf32, #tpu.memory_space<vmem>>, vector<8x128xf32>,
    } else {
    }
    return
  }
  func.func @transform_0(%arg0: i32, %arg1: i32) -> (i32, i32) {
    %c0_i32 = arith.constant 0 : i32
    return %arg0, %arg1 : i32, i32
  }
  func.func @transform_1(%arg0: i32, %arg1: i32) -> (i32, i32) {
    %c0_i32 = arith.constant 0 : i32
    %c0_i32_0 = arith.constant 0 : i32
    return %arg1, %c0_i32 : i32, i32
  }
  func.func @transform_2(%arg0: i32, %arg1: i32) -> (i32, i32) {
    %c0_i32 = arith.constant 0 : i32
    %c0_i32_0 = arith.constant 0 : i32
    %c0_i32_1 = arith.constant 0 : i32
    return %c0_i32, %c0_i32_0 : i32, i32
  }
  func.func @transform_3(%arg0: i32, %arg1: i32) -> (i32, i32) {
    %c0_i32 = arith.constant 0 : i32
    %c0_i32_0 = arith.constant 0 : i32
    %c0_i32_1 = arith.constant 0 : i32
    return %c0_i32, %c0_i32_0 : i32, i32
  }
  func.func @transform_4(%arg0: i32, %arg1: i32) -> (i32, i32) {
    %c0_i32 = arith.constant 0 : i32
    %c0_i32_0 = arith.constant 0 : i32
    %c0_i32_1 = arith.constant 0 : i32
    return %c0_i32, %c0_i32_0 : i32, i32
  }
  func.func @transform_5(%arg0: i32, %arg1: i32) -> (i32, i32) {
    %c0_i32 = arith.constant 0 : i32
    %c0_i32_0 = arith.constant 0 : i32
    return %arg0, %c0_i32 : i32, i32
  }
  func.func @transform_6(%arg0: i32, %arg1: i32) -> (i32, i32) {
    %c0_i32 = arith.constant 0 : i32
    %c0_i32_0 = arith.constant 0 : i32
    return %arg0, %c0_i32 : i32, i32
  }
}

</mosaic_0001>

<bundles_post_ra>
// kernel: tpu_custom_call.1
= control target key start
LH: loop header
LB: loop body
LE: loop exit
PB: predicated region body
PF: predicated region fallthrough
CT: control target
= control target key end

     0   :  { %12 = vsyncpa [#allocation4], 0  ;;  %s1033_s0 = inlined_call_operand.vmem [shape: f32[8,1024], index: 0, kind: input, shape index: {}]   ;;  %s1034_s1 = inlined_call_operand.vmem [shape: f32[1024,32], index: 1, kind: input, shape index: {}]   ;;  %s1035_s2 = inlined_call_operand.vmem [shape: f32[1,32], index: 2, kind: input, shape index: {}]   ;;  %s1036_s3 = inlined_call_operand.vmem [shape: f32[32,256], index: 3, kind: input, shape index: {}]   ;;  %s1037_s4 = inlined_call_operand.vmem [shape: f32[1,256], index: 4, kind: input, shape index: {}]   ;;  %s1038_s5 = inlined_call_operand.hbm [shape: f32[8,128], index: 5, kind: output, shape index: {0}]   ;;  %s1039_s6 = inlined_call_operand.hbm [shape: f32[8,128], index: 6, kind: output, shape index: {1}]  }
   0x1   :  { %13 = vsyncpa [#allocation6], 0  ;;  %s864_s21 = smov 0   ;;  %s866_s22 = smov 0  }
   0x2   :  { %s868_s23 = smov 0  }
   0x3 LB: > { %s674_s24 = sadd.s32 4294967295, %s825_s23   ;;  %s28_s25 = sadd.s32 1, %s821_s22  ;;  %s825_s23 = sphi %s868_s23, %s19_s23   ;;  %s821_s22 = sphi %s866_s22, %s1042_s22   ;;  %s817_s21 = sphi %s864_s21, %s1041_s21  }
   0x4   : > { %p29_p0 = scmp.ge.s32.totalorder %s28_s25, 2  ;;  %p677_p1 = scmp.ge.s32.totalorder %s825_s23, 1 }
   0x5   : > { %p247_p2 = scmp.lt.s32.totalorder %s825_s23, 3 }
   0x6   : > { %s1044_s25 = smov (%p29_p0, %s28_s25), 0 }
   0x7   : > { %p248_p3 = pnand %p677_p1, %p247_p2 }
   0x8   : > { %s678_s26 = sshll.u32 (!%p248_p3), %s817_s21, 2  ;;  %s680_s27 = sshll.u32 (!%p248_p3), %s817_s21, 6 }
   0x9   : > { %251 = sbr.rel (%p248_p3) target bundleno = 613 (0x265), region = 40  ;;  %p284_p4 = scmp.lt.s32.totalorder (!%p248_p3), %s678_s26, 7 }
   0xa   : > { %p292_p5 = scmp.lt.s32.totalorder (!%p248_p3), %s680_s27, 127  ;;  %p682_p6 = scmp.ne.s32.totalorder (!%p248_p3), %s817_s21, 0 }
   0xe   : > { %s1046_s26 = smov (!%p284_p4, %s678_s26), 7  ;;  %s1048_s27 = smov (!%p292_p5, %s680_s27), 127 }
   0xf   : > { %s679_s28 = sshll.u32 %s1046_s26, 3  ;;  %s681_s8 = sshll.u32 %s1048_s27, 3 }
  0x10   : > { %s890_s7 = scalar_lea.vmem %s1033_s0, %s679_s28  ;;  %s895_s11 = scalar_lea.vmem %s1034_s1, %s681_s8 }
  0x11   : > { %300 = sbr.rel (%p682_p6) target bundleno = 24 (0x18), region = 44 }
  0x16   : > { %v730_v0 = vld [vmem:[%s1035_s2] ss:$0 sm:$0xff]  ;;  %vm305_vm0 = vcmask 261120  }
  0x17   : > { %306 = vst.msk [vmem:[#allocation2] sm:$0xff] %vm305_vm0, %v730_v0 }
  0x18 PF: > { %v359_v1 = vld [vmem:[%s895_s11 + $0x178] sm:$0xff]  ;;  %v358_v2 = vld [vmem:[%s895_s11 + $0x170] sm:$0xff]  ;;  %v357_v6 = vld [vmem:[%s895_s11 + $0x168] sm:$0xff]  ;;  %vm457_vm1 = vcmask 261120   ;;  %p683_p7 = scmp.ne.s32.totalorder %s817_s21, 1 }
  0x19   : > { %v375_v3 = vld [vmem:[%s895_s11 + $0x1f8] sm:$0xff]  ;;  %416 = vmatpush.msra.mxu2 %v359_v1  ;;  %v374_v7 = vld [vmem:[%s895_s11 + $0x1f0] sm:$0xff]  ;;  %v373_v10 = vld [vmem:[%s895_s11 + $0x1e8] sm:$0xff] }
  0x1a   : > { %436 = vmatpush.msra.mxu3 %v375_v3  ;;  %v327_v4 = vld [vmem:[%s895_s11 + $0x78] sm:$0xff]  ;;  %v326_v8 = vld [vmem:[%s895_s11 + $0x70] sm:$0xff]  ;;  %v325_v11 = vld [vmem:[%s895_s11 + $0x68] sm:$0xff] }
  0x1b   : > { %v343_v5 = vld [vmem:[%s895_s11 + $0xf8] sm:$0xff]  ;;  %376 = vmatpush.msra.mxu0 %v327_v4  ;;  %v342_v9 = vld [vmem:[%s895_s11 + $0xf0] sm:$0xff]  ;;  %417 = vmatpush.msra.mxu2 %v358_v2  ;;  %v356_v12 = vld [vmem:[%s895_s11 + $0x160] sm:$0xff] }
  0x1c   : > { %396 = vmatpush.msra.mxu1 %v343_v5  ;;  %437 = vmatpush.msra.mxu3 %v374_v7  ;;  %v341_v13 = vld [vmem:[%s895_s11 + $0xe8] sm:$0xff]  ;;  %v372_v14 = vld [vmem:[%s895_s11 + $0x1e0] sm:$0xff]  ;;  %v355_v17 = vld [vmem:[%s895_s11 + $0x158] sm:$0xff] }
  0x1d   : > { %377 = vmatpush.msra.mxu0 %v326_v8  ;;  %418 = vmatpush.msra.mxu2 %v357_v6  ;;  %v324_v15 = vld [vmem:[%s895_s11 + $0x60] sm:$0xff]  ;;  %v371_v18 = vld [vmem:[%s895_s11 + $0x1d8] sm:$0xff]  ;;  %v354_v21 = vld [vmem:[%s895_s11 + $0x150] sm:$0xff] }
  0x1e   : > { %397 = vmatpush.msra.mxu1 %v342_v9  ;;  %438 = vmatpush.msra.mxu3 %v373_v10  ;;  %v340_v16 = vld [vmem:[%s895_s11 + $0xe0] sm:$0xff]  ;;  %v323_v19 = vld [vmem:[%s895_s11 + $0x58] sm:$0xff]  ;;  %v370_v22 = vld [vmem:[%s895_s11 + $0x1d0] sm:$0xff] }
  0x1f   : > { %378 = vmatpush.msra.mxu0 %v325_v11  ;;  %419 = vmatpush.msra.mxu2 %v356_v12  ;;  %v339_v20 = vld [vmem:[%s895_s11 + $0xd8] sm:$0xff]  ;;  %v322_v23 = vld [vmem:[%s895_s11 + $0x50] sm:$0xff]  ;;  %v353_v25 = vld [vmem:[%s895_s11 + $0x148] sm:$0xff] }
  0x20   : > { %398 = vmatpush.msra.mxu1 %v341_v13  ;;  %439 = vmatpush.msra.mxu3 %v372_v14  ;;  %v338_v24 = vld [vmem:[%s895_s11 + $0xd0] sm:$0xff]  ;;  %v369_v26 = vld [vmem:[%s895_s11 + $0x1c8] sm:$0xff]  ;;  %v352_v29 = vld [vmem:[%s895_s11 + $0x140] sm:$0xff] }
  0x21   : > { %379 = vmatpush.msra.mxu0 %v324_v15  ;;  %420 = vmatpush.msra.mxu2 %v355_v17  ;;  %v321_v27 = vld [vmem:[%s895_s11 + $0x48] sm:$0xff]  ;;  %v368_v30 = vld [vmem:[%s895_s11 + $0x1c0] sm:$0xff]  ;;  %v351_v33 = vld [vmem:[%s895_s11 + $0x138] sm:$0xff] }
  0x22   : > { %399 = vmatpush.msra.mxu1 %v340_v16  ;;  %440 = vmatpush.msra.mxu3 %v371_v18  ;;  %v337_v28 = vld [vmem:[%s895_s11 + $0xc8] sm:$0xff]  ;;  %v320_v31 = vld [vmem:[%s895_s11 + $0x40] sm:$0xff]  ;;  %v367_v34 = vld [vmem:[%s895_s11 + $0x1b8] sm:$0xff] }
  0x23   : > { %380 = vmatpush.msra.mxu0 %v323_v19  ;;  %421 = vmatpush.msra.mxu2 %v354_v21  ;;  %v336_v32 = vld [vmem:[%s895_s11 + $0xc0] sm:$0xff]  ;;  %v319_v35 = vld [vmem:[%s895_s11 + $0x38] sm:$0xff]  ;;  %v350_v37 = vld [vmem:[%s895_s11 + $0x130] sm:$0xff] }
  0x24   : > { %400 = vmatpush.msra.mxu1 %v339_v20  ;;  %441 = vmatpush.msra.mxu3 %v370_v22  ;;  %v335_v36 = vld [vmem:[%s895_s11 + $0xb8] sm:$0xff]  ;;  %v366_v38 = vld [vmem:[%s895_s11 + $0x1b0] sm:$0xff]  ;;  %v349_v41 = vld [vmem:[%s895_s11 + $0x128] sm:$0xff] }
  0x25   : > { %381 = vmatpush.msra.mxu0 %v322_v23  ;;  %422 = vmatpush.msra.mxu2 %v353_v25  ;;  %v318_v39 = vld [vmem:[%s895_s11 + $0x30] sm:$0xff]  ;;  %v365_v42 = vld [vmem:[%s895_s11 + $0x1a8] sm:$0xff]  ;;  %v348_v45 = vld [vmem:[%s895_s11 + $0x120] sm:$0xff] }
  0x26   : > { %401 = vmatpush.msra.mxu1 %v338_v24  ;;  %442 = vmatpush.msra.mxu3 %v369_v26  ;;  %v334_v40 = vld [vmem:[%s895_s11 + $0xb0] sm:$0xff]  ;;  %v317_v43 = vld [vmem:[%s895_s11 + $0x28] sm:$0xff]  ;;  %v364_v46 = vld [vmem:[%s895_s11 + $0x1a0] sm:$0xff] }
  0x27   : > { %382 = vmatpush.msra.mxu0 %v321_v27  ;;  %423 = vmatpush.msra.mxu2 %v352_v29  ;;  %v333_v44 = vld [vmem:[%s895_s11 + $0xa8] sm:$0xff]  ;;  %v316_v47 = vld [vmem:[%s895_s11 + $0x20] sm:$0xff]  ;;  %v347_v49 = vld [vmem:[%s895_s11 + $0x118] sm:$0xff] }
  0x28   : > { %402 = vmatpush.msra.mxu1 %v337_v28  ;;  %443 = vmatpush.msra.mxu3 %v368_v30  ;;  %v332_v48 = vld [vmem:[%s895_s11 + $0xa0] sm:$0xff]  ;;  %v363_v50 = vld [vmem:[%s895_s11 + $0x198] sm:$0xff]  ;;  %v346_v53 = vld [vmem:[%s895_s11 + $0x110] sm:$0xff] }
  0x29   : > { %383 = vmatpush.msra.mxu0 %v320_v31  ;;  %424 = vmatpush.msra.mxu2 %v351_v33  ;;  %v315_v51 = vld [vmem:[%s895_s11 + $0x18] sm:$0xff]  ;;  %v362_v54 = vld [vmem:[%s895_s11 + $0x190] sm:$0xff]  ;;  %v345_v57 = vld [vmem:[%s895_s11 + $0x108] sm:$0xff] }
  0x2a   : > { %403 = vmatpush.msra.mxu1 %v336_v32  ;;  %444 = vmatpush.msra.mxu3 %v367_v34  ;;  %v331_v52 = vld [vmem:[%s895_s11 + $0x98] sm:$0xff]  ;;  %v314_v55 = vld [vmem:[%s895_s11 + $0x10] sm:$0xff]  ;;  %v361_v58 = vld [vmem:[%s895_s11 + $0x188] sm:$0xff] }
  0x2b   : > { %384 = vmatpush.msra.mxu0 %v319_v35  ;;  %425 = vmatpush.msra.mxu2 %v350_v37  ;;  %v330_v56 = vld [vmem:[%s895_s11 + $0x90] sm:$0xff]  ;;  %v313_v59 = vld [vmem:[%s895_s11 + $0x8] sm:$0xff]  ;;  %v344_v61 = vld [vmem:[%s895_s11 + $0x100] sm:$0xff] }
  0x2c   : > { %404 = vmatpush.msra.mxu1 %v335_v36  ;;  %445 = vmatpush.msra.mxu3 %v366_v38  ;;  %v329_v60 = vld [vmem:[%s895_s11 + $0x88] sm:$0xff]  ;;  %v360_v62 = vld [vmem:[%s895_s11 + $0x180] sm:$0xff]  ;;  %v310_v63 = vld [vmem:[%s890_s7 + $0x10] sm:$0xff] }
  0x2d   : > { %385 = vmatpush.msra.mxu0 %v318_v39  ;;  %426 = vmatpush.msra.mxu2 %v349_v41  ;;  %v311_v0 = vld [vmem:[%s890_s7 + $0x18] sm:$0xff]  ;;  %v312_v1 = vld [vmem:[%s895_s11] sm:$0xff]  ;;  %v309_v4 = vld [vmem:[%s890_s7 + $0x8] sm:$0xff] }
  0x2e   : > { %405 = vmatpush.msra.mxu1 %v334_v40  ;;  %446 = vmatpush.msra.mxu3 %v365_v42  ;;  %v328_v2 = vld [vmem:[%s895_s11 + $0x80] sm:$0xff] }
  0x2f   : > { %386 = vmatpush.msra.mxu0 %v317_v43  ;;  %427 = vmatpush.msra.mxu2 %v348_v45  ;;  %v308_v3 = vld [vmem:[%s890_s7] sm:$0xff] }
  0x30   : > { %406 = vmatpush.msra.mxu1 %v333_v44  ;;  %447 = vmatpush.msra.mxu3 %v364_v46  ;;  %v307_v11 = vld [vmem:[#allocation2] sm:$0xff] }
  0x31   : > { %387 = vmatpush.msra.mxu0 %v316_v47  ;;  %428 = vmatpush.msra.mxu2 %v347_v49 }
  0x32   : > { %407 = vmatpush.msra.mxu1 %v332_v48  ;;  %448 = vmatpush.msra.mxu3 %v363_v50 }
  0x33   : > { %388 = vmatpush.msra.mxu0 %v315_v51  ;;  %429 = vmatpush.msra.mxu2 %v346_v53 }
  0x34   : > { %408 = vmatpush.msra.mxu1 %v331_v52  ;;  %449 = vmatpush.msra.mxu3 %v362_v54 }
  0x35   : > { %389 = vmatpush.msra.mxu0 %v314_v55  ;;  %430 = vmatpush.msra.mxu2 %v345_v57 }
  0x36   : > { %409 = vmatpush.msra.mxu1 %v330_v56  ;;  %450 = vmatpush.msra.mxu3 %v361_v58 }
  0x37   : > { %390 = vmatpush.msra.mxu0 %v313_v59  ;;  %431 = vmatpush.msra.mxu2 %v344_v61 }
  0x38   : > { %410 = vmatpush.msra.mxu1 %v329_v60  ;;  %451 = vmatpush.msra.mxu3 %v360_v62 }
  0x39   : > { %432 = vmatmul.f32.vlgmr.msra.gmra.mxu2 %v310_v63  ;;  %452 = vmatmul.f32.vlgmr.msra.gmra.mxu3 %v311_v0 }
  0x3a   : > { %391 = vmatpush.msra.mxu0 %v312_v1  ;;  %411 = vmatpush.msra.mxu1 %v328_v2 }
  0x3b   : > { %392 = vmatmul.f32.vlgmr.msra.gmra.mxu0 %v308_v3  ;;  %412 = vmatmul.f32.vlgmr.msra.gmra.mxu1 %v309_v4 }
  0xb8   : > { %v393_v5 = vpop.f32.mrf.mxu0  ;;  %v413_v6 = vpop.f32.mrf.mxu1 }
  0xb9   : > { %v414_v7 = vadd.f32 %v413_v6, %v393_v5 }
  0xbc   : > { %v433_v8 = vpop.f32.mrf.mxu2  ;;  %v453_v9 = vpop.f32.mrf.mxu3 }
  0xbd   : > { %v434_v10 = vadd.f32 %v433_v8, %v414_v7 }
  0xbf   : > { %v454_v12 = vadd.f32 %v453_v9, %v434_v10  ;;  %462 = sbr.rel (%p683_p7) target bundleno = 603 (0x25b), region = 48 }
  0xc1   : > { %v456_v13 = vadd.f32 %v454_v12, %v307_v11 }
  0xc3   : > { %458 = vst.msk [vmem:[#allocation2] sm:$0xff] %vm457_vm1, %v456_v13 }
  0xc4   : > { %v470_v14 = vld [vmem:[%s1036_s3 + $0x30] sm:$0xff]  ;;  %v468_v15 = vld [vmem:[%s1036_s3 + $0x20] sm:$0xff]  ;;  %v471_v16 = vld [vmem:[%s1036_s3 + $0x38] sm:$0xff] }
  0xc5   : > { %493 = vmatpush.msra.mxu0 %v470_v14  ;;  %v466_v17 = vld [vmem:[%s1036_s3 + $0x10] sm:$0xff]  ;;  %513 = vmatpush.msra.mxu1 %v471_v16  ;;  %v469_v18 = vld [vmem:[%s1036_s3 + $0x28] sm:$0xff]  ;;  %v467_v19 = vld [vmem:[%s1036_s3 + $0x18] sm:$0xff] }
  0xc6   : > { %v464_v20 = vld [vmem:[%s1036_s3] sm:$0xff]  ;;  %v465_v22 = vld [vmem:[%s1036_s3 + $0x8] sm:$0xff] }
  0xc7   : > { %494 = vmatpush.msra.mxu0 %v468_v15  ;;  %514 = vmatpush.msra.mxu1 %v469_v18  ;;  %v472_v23 = vld [vmem:[%s1037_s4] sm:$0x3] }
  0xc8   : > { %v474_v24 = vperm.slane %v472_v23, 0  ;;  %v475_v27 = vperm.slane %v472_v23, 1 }
  0xc9   : > { %495 = vmatpush.msra.mxu0 %v466_v17  ;;  %515 = vmatpush.msra.mxu1 %v467_v19 }
  0xca   : > { %v463_v21 = vld [vmem:[#allocation2] sm:$0xff] }
  0xcb   : > { %496 = vmatpush.msra.mxu0 %v464_v20  ;;  %516 = vmatpush.msra.mxu1 %v465_v22 }
  0xcc   : > { %684 = vmatmul.msk.f32.vlgmr.msra.gmra.mxu0 %vm457_vm1, %v463_v21  ;;  %685 = vmatmul.msk.f32.vlgmr.msra.gmra.mxu1 %vm457_vm1, %v463_v21 }
 0x149   : > { %v498_v25 = vpop.f32.mrf.mxu0  ;;  %v518_v28 = vpop.f32.mrf.mxu1 }
 0x14a   : > { %v499_v26 = vadd.f32 %v498_v25, %v474_v24  ;;  %v519_v29 = vadd.f32 %v518_v28, %v475_v27 }
 0x14c   : > { %521 = vmax.xlane.f32.xlu0 %v499_v26 }
 0x154   : > { %544 = vmax.xlane.f32.xlu0 %v519_v29 }
 0x1bf   : > { %v522_v30 = vpop.xlane.xlu0 %521 }
 0x1c0   : > { %v523_v31 = vsub.f32 %v499_v26, %v522_v30 }
 0x1c2   : > { %v524_v32 = vmul.f32 1.442695, %v523_v31 }
 0x1c4   : > { %731 = vpow2.f32 %v524_v32 }
 0x1c7   : > { %v545_v33 = vpop.xlane.xlu0 %544 }
 0x1c8   : > { %v546_v34 = vsub.f32 %v519_v29, %v545_v33 }
 0x1ca   : > { %v732_v35 = vpop.eup %731  ;;  %v547_v36 = vmul.f32 1.442695, %v546_v34 }
 0x1cb   : > { %526 = vadd.xlane.f32.xlu1 %v732_v35 }
 0x1cc   : > { %733 = vpow2.f32 %v547_v36 }
 0x1d2   : > { %v734_v37 = vpop.eup %733 }
 0x1d3   : > { %549 = vadd.xlane.f32.xlu1 %v734_v37 }
 0x23e   : > { %v527_v38 = vpop.xlane.xlu1 %526 }
 0x23f   : > { %735 = vrcp.f32 %v527_v38  ;;  %v539_v43 = vand.u32 2147483648, %v527_v38  ;;  %v537_v45 = vand.u32 2147483647, %v527_v38  ;;  %vm533_vm3 = vweird.f32 %v527_v38 }
 0x241   : > { %v540_v48 = vor.u32 1.1754944e-38, %v539_v43  ;;  %vm538_vm5 = vcmp.eq.f32.partialorder %v537_v45, 8.507059e+37 }
 0x245   : > { %v736_v39 = vpop.eup %735 }
 0x246   : > { %v529_v40 = vmul.f32 %v736_v39, %v527_v38  ;;  %v550_v41 = vpop.xlane.xlu1 %549  ;;  %vm534_vm2 = vweird.f32 %v736_v39 }
 0x247   : > { %737 = vrcp.f32 %v550_v41  ;;  %vm535_vm4 = vmor %vm533_vm3, %vm534_vm2  ;;  %v562_v54 = vand.u32 2147483648, %v550_v41  ;;  %v560_v56 = vand.u32 2147483647, %v550_v41  ;;  %vm556_vm7 = vweird.f32 %v550_v41 }
 0x248   : > { %v530_v42 = vsub.f32 1.0, %v529_v40 }
 0x249   : > { %v563_v58 = vor.u32 1.1754944e-38, %v562_v54  ;;  %vm561_vm9 = vcmp.eq.f32.partialorder %v560_v56, 8.507059e+37 }
 0x24a   : > { %v531_v44 = vmul.f32 %v736_v39, %v530_v42 }
 0x24c   : > { %v532_v46 = vadd.f32 %v736_v39, %v531_v44 }
 0x24d   : > { %v738_v47 = vpop.eup %737 }
 0x24e   : > { %v536_v49 = vsel %vm535_vm4, %v736_v39, %v532_v46  ;;  %v552_v50 = vmul.f32 %v738_v47, %v550_v41  ;;  %vm557_vm6 = vweird.f32 %v738_v47 }
 0x24f   : > { %v541_v51 = vsel %vm538_vm5, %v540_v48, %v536_v49  ;;  %vm558_vm8 = vmor %vm556_vm7, %vm557_vm6 }
 0x250   : > { %v542_v52 = vmul.f32 %v732_v35, %v541_v51  ;;  %v553_v53 = vsub.f32 1.0, %v552_v50 }
 0x252   : > { %543 = vst [vmem:[#allocation3] sm:$0xff] %v542_v52  ;;  %v554_v55 = vmul.f32 %v738_v47, %v553_v53 }
 0x254   : > { %v555_v57 = vadd.f32 %v738_v47, %v554_v55 }
 0x256   : > { %v559_v59 = vsel %vm558_vm8, %v738_v47, %v555_v57 }
 0x257   : > { %v564_v60 = vsel %vm561_vm9, %v563_v58, %v559_v59 }
 0x258   : > { %v565_v61 = vmul.f32 %v734_v37, %v564_v60 }
 0x25a   : > { %566 = vst [vmem:[#allocation5] sm:$0xff] %v565_v61 }
 0x25b PF: > { %p1002_p8 = scmp.eq.s32.totalorder %s674_s24, 1  ;;  %s577_s15 = sshll.u32 %s1038_s5, 4  ;;  %s578_s15 = int_to_ptr.hbm [resolvable:$true] %s577_s15 }
 0x25c   : > { %s827_s16 = smov [#allocation3]   ;;  %s828_s18 = smov [#allocation5]  }
 0x25d   : > { %s575_s17 = sshll.u32 %s827_s16, 4  ;;  %s589_s19 = sshll.u32 %s828_s18, 4  ;;  %s576_s17 = int_to_ptr.vmem [resolvable:$true] %s575_s17  ;;  %s590_s19 = int_to_ptr.vmem [resolvable:$true] %s589_s19 }
 0x25e   : > { %693 = dma.vmem_to_hbm [thread:$0]  (%p1002_p8), %s576_s17, 128, %s578_s15, [#allocation4]  }
 0x25f   : > { %s591_s26 = sshll.u32 %s1039_s6, 4  ;;  %s592_s26 = int_to_ptr.hbm [resolvable:$true] %s591_s26 }
 0x260   : > { %695 = dma.vmem_to_hbm [thread:$0]  (%p1002_p8), %s590_s19, 128, %s592_s26, [#allocation6]  }
 0x261   : > { %808 = dma.done.wait (%p1002_p8), [#allocation4], 128  }
 0x262   : > { %810 = vsyncadd (%p1002_p8), [#allocation4], 4294967168 }
 0x263   : > { %812 = dma.done.wait (%p1002_p8), [#allocation6], 128  }
 0x264   : > { %814 = vsyncadd (%p1002_p8), [#allocation6], 4294967168 }
 0x265 PF: > { %s19_s23 = sadd.s32 1, %s825_s23   ;;  %s1041_s21 = smov %s821_s22 }
 0x266   : > { %p16_p9 = scmp.ge.s32.totalorder %s19_s23, 4   ;;  %s1042_s22 = smov %s1044_s25 }
 0x268   :  { %18 = sbr.rel (!%p16_p9) target bundleno = 3 (0x3), region = 88 }
 0x26d   :  { %610 = vsyncpa [#allocation4], 1 }
 0x26e   :  { %612 = vsyncpa [#allocation4 + $0x1], 1 }
 0x26f   :  { %613 = vsyncpa [#allocation6], 1 }

</bundles_post_ra>
